<compile_context>
chip_gen: v7x
topology: tpu7x:2x2x1
jax: 0.10.0
libtpu: 0.0.40
codegen_flags: <defaults>
</compile_context>

<pallas_src>
import jax
import jax.numpy as jnp
from jax.experimental import pallas as pl
from jax.experimental.pallas import tpu as pltpu

_LANES = 128
_SUBLANES = 8
_MAX_TILE_BYTES = 4 * 1024 * 1024      # per buffer; 4 double-buffered bufs = 16 MiB
_VMEM_LIMIT_BYTES = 32 * 1024 * 1024   # explicit scoped-VMEM limit, safe on v5e/v6e/v7x


def _base_encoder_kernel(x_ref, o_ref):
    # Identity pass-through of one lane-dense tile (the only semantics the
    # abstract BaseEncoder defines).  Subclass encoders replace this body.
    o_ref[...] = x_ref[...]


def _identity_passthrough(x):
    """Identity copy of `x` through a Pallas kernel, laid out lane-dense."""
    orig_shape = x.shape
    n = x.size
    itemsize = jnp.dtype(x.dtype).itemsize

    # Packed-tile-aware minimum rows: 8 for f32, 16 for bf16, 32 for int8/fp8.
    packing = max(1, 4 // itemsize)
    min_rows = _SUBLANES * packing
    tile_elems = min_rows * _LANES

    # Flatten to a lane-dense [rows, 128] slab; pad ragged tails up to one
    # packed tile so the kernel path is uniform (pad/slice happen outside the
    # kernel and are negligible at encoder scales).
    flat = x.reshape(-1)
    pad = (-n) % tile_elems
    if pad:
        flat = jnp.pad(flat, (0, pad))
    rows = flat.size // _LANES
    flat = flat.reshape(rows, _LANES)

    # Largest tile that is a multiple of the packed sublane tile and keeps one
    # buffer under _MAX_TILE_BYTES; grid handles the partial last block.
    budget_rows = max(min_rows,
                      (_MAX_TILE_BYTES // (_LANES * itemsize)) // min_rows * min_rows)
    tile_rows = min(budget_rows, rows)
    grid = (pl.cdiv(rows, tile_rows),)

    out = pl.pallas_call(
        _base_encoder_kernel,
        out_shape=jax.ShapeDtypeStruct((rows, _LANES), x.dtype),
        grid_spec=pltpu.PrefetchScalarGridSpec(
            num_scalar_prefetch=0,
            grid=grid,
            in_specs=[pl.BlockSpec((tile_rows, _LANES), lambda i: (i, 0))],
            out_specs=pl.BlockSpec((tile_rows, _LANES), lambda i: (i, 0)),
        ),
        compiler_params=pltpu.CompilerParams(
            dimension_semantics=("parallel",),
            vmem_limit_bytes=_VMEM_LIMIT_BYTES,
        ),
        cost_estimate=pl.CostEstimate(
            flops=0,
            transcendentals=0,
            bytes_accessed=2 * flat.size * itemsize,
        ),
    )(flat)

    out = out.reshape(-1)
    if pad:
        out = out[:n]
    return out.reshape(orig_shape)


class BaseEncoderPallas:
    """JAX/Pallas mirror of the abstract BaseEncoder (identity pass-through)."""

    def __init__(self, spec_dim, fc_feat_dim, attn_feat_dim):
        # The PyTorch __init__ creates no parameters; nothing to initialize.
        self.spec_dim = spec_dim
        self.fc_feat_dim = fc_feat_dim
        self.attn_feat_dim = attn_feat_dim

    def __call__(self, x):
        # x: [B, T, spec_dim]
        assert x.shape[-1] == self.spec_dim
        return _identity_passthrough(x)


if __name__ == "__main__":
    key = jax.random.PRNGKey(0)

    # Small shapes consistent with an audio encoder: batch=2, frames=8, bins=32.
    spec_dim, fc_feat_dim, attn_feat_dim = 32, 32, 32
    B, T = 2, 8
    x = jax.random.normal(key, (B, T, spec_dim), dtype=jnp.float32)

    enc = BaseEncoderPallas(spec_dim, fc_feat_dim, attn_feat_dim)
    y = jax.block_until_ready(enc(x))
    assert y.shape == (B, T, spec_dim)
    assert jnp.array_equal(y, x)

    # Lane-exact shape (numel a multiple of the packed tile): 2*12*128 elems.
    B2, T2, D2 = 2, 12, 128
    x2 = jax.random.normal(key, (B2, T2, D2), dtype=jnp.float32)
    enc2 = BaseEncoderPallas(D2, fc_feat_dim, attn_feat_dim)
    y2 = jax.block_until_ready(enc2(x2))
    assert y2.shape == (B2, T2, D2)
    assert jnp.array_equal(y2, x2)

    # Ragged numel + packed dtype (bf16) exercises the pad path and the
    # dtype-dependent minimum tile rows.
    B3, T3, D3 = 3, 5, 7
    x3 = jax.random.normal(key, (B3, T3, D3), dtype=jnp.bfloat16)
    enc3 = BaseEncoderPallas(D3, fc_feat_dim, attn_feat_dim)
    y3 = jax.block_until_ready(enc3(x3))
    assert y3.shape == (B3, T3, D3)
    assert jnp.array_equal(y3, x3)

    print("KERNEL_OK")
</pallas_src>

<mosaic_0001>
module attributes {stable_mosaic.version = 11 : i64} {
  func.func @_base_encoder_kernel(%arg0: i32, %arg1: memref<8x128xf32, #tpu.memory_space<vmem>>, %arg2: memref<8x128xf32, #tpu.memory_space<vmem>>) attributes {dimension_semantics = [#tpu.dimension_semantics<parallel>], iteration_bounds = array<i64: 1>, scalar_prefetch = 0 : i64, scratch_operands = 0 : i64, tpu.core_type = #tpu.core_type<tc>, window_params = [{transform_indices = @transform_0, window_bounds = array<i64: 8, 128>}, {transform_indices = @transform_1, window_bounds = array<i64: 8, 128>}]} {
    %c0 = arith.constant 0 : index
    %c0_0 = arith.constant 0 : index
    %0 = vector.load %arg1[%c0, %c0_0] : memref<8x128xf32, #tpu.memory_space<vmem>>, vector<8x128xf32>
    %c0_1 = arith.constant 0 : index
    %c0_2 = arith.constant 0 : index
    %1 = vector.load %arg2[%c0_1, %c0_2] : memref<8x128xf32, #tpu.memory_space<vmem>>, vector<8x128xf32>
    tpu.vector_store %arg2[%c0_1, %c0_2], %0 {strides = array<i32>} : memref<8x128xf32, #tpu.memory_space<vmem>>, vector<8x128xf32>,
    return
  }
  func.func @transform_0(%arg0: i32) -> (i32, i32) {
    %c0_i32 = arith.constant 0 : i32
    %c0_i32_0 = arith.constant 0 : i32
    return %arg0, %c0_i32 : i32, i32
  }
  func.func @transform_1(%arg0: i32) -> (i32, i32) {
    %c0_i32 = arith.constant 0 : i32
    %c0_i32_0 = arith.constant 0 : i32
    return %arg0, %c0_i32 : i32, i32
  }
}

</mosaic_0001>

<bundles_post_ra>
// kernel: tpu_custom_call.1
= control target key start
LH: loop header
LB: loop body
LE: loop exit
PB: predicated region body
PF: predicated region fallthrough
CT: control target
= control target key end

     0   :  { %6 = vsyncpa [#allocation3], 0  ;;  %s124_s0 = inlined_call_operand.hbm [shape: f32[8,128], index: 0, kind: input, shape index: {}]   ;;  %s125_s1 = inlined_call_operand.hbm [shape: f32[8,128], index: 1, kind: output, shape index: {}]  }
   0x1   :  { %7 = vsyncpa [#allocation4], 0  ;;  %s88_s6 = smov [#allocation2]   ;;  %s40_s10 = scalar_lea.hbm %s124_s0, 128 }
   0x2   :  { %s14_s7 = sshll.u32 %s88_s6, 4  ;;  %p41_p0 = scmp.ne.s32.totalorder %s124_s0, %s40_s10  ;;  %s15_s7 = int_to_ptr.vmem [resolvable:$true] %s14_s7 }
   0x3   :  { %p44_p1 = scmp.lt.u32.totalorder %s40_s10, %s124_s0 }
   0x5   :  { %p46_p2 = pnand %p44_p1, %p41_p0 }
   0x7   :  { %49 = shalt.err (!%p46_p2)
}
   0x8   :  { %s50_s15 = scalar_lea.vmem %s15_s7, 128  ;;  %p55_p4 = scmp.lt.s32.totalorder %s15_s7, %s15_s7 }
   0x9   :  { %p51_p3 = scmp.ne.s32.totalorder %s15_s7, %s50_s15  ;;  %p56_p5 = scmp.lt.s32.totalorder %s50_s15, %s50_s15 }
   0xb   :  { %p57_p6 = por %p56_p5, %p55_p4 }
   0xd   :  { %p58_p7 = pnand %p57_p6, %p51_p3 }
   0xf   :  { %61 = shalt.err (!%p58_p7)
}
  0x10   :  { %17 = dma.hbm_to_vmem [thread:$0]  %s124_s0, 128, %s15_s7, [#allocation3]  }
  0x11   :  { %84 = dma.done.wait [#allocation3], 128  }
  0x12   :  { %85 = vsyncadd [#allocation3], 4294967168  ;;  %s89_s18 = smov [#allocation5]   ;;  %v21_v0 = vld [vmem:[#allocation2] sm:$0xff] }
  0x13   :  { %s29_s19 = sshll.u32 %s89_s18, 4  ;;  %22 = vst [vmem:[#allocation5] sm:$0xff] %v21_v0  ;;  %s30_s19 = int_to_ptr.vmem [resolvable:$true] %s29_s19 }
  0x14   :  { %s62_s20 = scalar_lea.vmem %s30_s19, 128  ;;  %p67_p9 = scmp.lt.s32.totalorder %s30_s19, %s30_s19 }
  0x15   :  { %p63_p8 = scmp.ne.s32.totalorder %s30_s19, %s62_s20  ;;  %p68_p10 = scmp.lt.s32.totalorder %s62_s20, %s62_s20 }
  0x17   :  { %p69_p11 = por %p68_p10, %p67_p9 }
  0x19   :  { %p70_p12 = pnand %p69_p11, %p63_p8 }
  0x1b   :  { %73 = shalt.err (!%p70_p12)
}
  0x1c   :  { %s74_s23 = scalar_lea.hbm %s125_s1, 128 }
  0x1d   :  { %p75_p13 = scmp.ne.s32.totalorder %s125_s1, %s74_s23  ;;  %p78_p0 = scmp.lt.u32.totalorder %s74_s23, %s125_s1 }
  0x1f   :  { %p80_p1 = pnand %p78_p0, %p75_p13 }
  0x21   :  { %83 = shalt.err (!%p80_p1)
}
  0x22   :  { %32 = dma.vmem_to_hbm [thread:$0]  %s30_s19, 128, %s125_s1, [#allocation4]  }
  0x23   :  { %86 = dma.done.wait [#allocation4], 128  }
  0x24   :  { %87 = vsyncadd [#allocation4], 4294967168 }
  0x25   :  { %36 = vsyncpa [#allocation3], 1 }
  0x26   :  { %37 = vsyncpa [#allocation4], 1 }

</bundles_post_ra>
